<compile_context>
chip_gen: v6e
topology: v6e:2x2x1
jax: 0.10.0
libtpu: 0.0.40
codegen_flags: <defaults>
</compile_context>

<pallas_src>
import functools

import jax
import jax.numpy as jnp
from jax import lax
from jax.experimental import pallas as pl
from jax.experimental.pallas import tpu as pltpu


def _mlp_subblock_kernel(x_ref, g_ref, b_ref, w1_ref, b1_ref, w2_ref, b2_ref,
                         o_ref):
    # x_ref: (TM, D) tile of flattened tokens.
    x = x_ref[...].astype(jnp.float32)

    # --- LayerNorm over last dim (eps matches torch.nn.LayerNorm default) ---
    mean = jnp.mean(x, axis=-1, keepdims=True)
    xc = x - mean
    var = jnp.mean(xc * xc, axis=-1, keepdims=True)
    xn = xc * lax.rsqrt(var + 1e-5)
    xn = xn * g_ref[...] + b_ref[...]            # affine (gamma, beta) in f32

    # --- Linear(dim -> hidden): bf16 operands, f32 MXU accumulation ---
    h = jnp.dot(xn.astype(jnp.bfloat16), w1_ref[...],
                preferred_element_type=jnp.float32)
    h = h + b1_ref[...]

    # --- GELU (exact erf form, matching torch.nn.GELU() default), in f32 ---
    h = 0.5 * h * (1.0 + lax.erf(h * 0.7071067811865475))

    # --- Linear(hidden -> dim): bf16 operands, f32 accumulation ---
    y = jnp.dot(h.astype(jnp.bfloat16), w2_ref[...],
                preferred_element_type=jnp.float32)
    y = y + b2_ref[...]

    o_ref[...] = y.astype(o_ref.dtype)


def _round_up(x, m):
    return (x + m - 1) // m * m


@functools.partial(jax.jit, static_argnames=("block_rows",))
def mlp_subblock(x, gamma, beta, w1, b1, w2, b2, *, block_rows=256):
    """x: (B, N, dim) -> (B, N, dim). Fused LayerNorm + MLP."""
    B, N, D = x.shape
    H = w1.shape[1]
    rows = B * N

    # ---- choose row tile & VMEM budget (all static, shape-derived ints) ----
    vmem_cap = 64 * 1024 * 1024  # conservative cap: fits v5e/v6e/v7x

    def vmem_estimate(tm):
        weights = 2 * (D * H + H * D) * 2            # bf16 w1/w2, double-buffered
        small = 2 * (3 * D + H) * 4                  # gamma/beta/b1/b2 (f32)
        io = 2 * tm * D * 2 * x.dtype.itemsize       # x + out tiles, double-buffered
        hidden = tm * H * 4                          # f32 hidden activation
        return weights + small + io + hidden + (2 << 20)   # +2 MiB headroom

    bm = min(block_rows, _round_up(rows, 8))
    while bm > 8 and vmem_estimate(bm) > vmem_cap:
        bm //= 2
    bm = max(8, _round_up(bm, 8))

    rows_p = _round_up(rows, bm)       # pad tokens so the grid tiles evenly

    x2 = x.reshape(rows, D)
    if rows_p != rows:
        x2 = jnp.pad(x2, ((0, rows_p - rows), (0, 0)))

    # Matmul operands in bf16 (native MXU path); LN affine & biases stay f32.
    w1b = w1.astype(jnp.bfloat16)
    w2b = w2.astype(jnp.bfloat16)
    g2 = gamma.reshape(1, D).astype(jnp.float32)
    be2 = beta.reshape(1, D).astype(jnp.float32)
    b1_2 = b1.reshape(1, H).astype(jnp.float32)
    b2_2 = b2.reshape(1, D).astype(jnp.float32)

    grid = (rows_p // bm,)
    # Constant index_map => these blocks are only DMA'd once across the grid.
    const = lambda shape: pl.BlockSpec(shape, lambda i: (0, 0))

    out = pl.pallas_call(
        _mlp_subblock_kernel,
        out_shape=jax.ShapeDtypeStruct((rows_p, D), x.dtype),
        grid_spec=pltpu.PrefetchScalarGridSpec(
            num_scalar_prefetch=0,
            grid=grid,
            in_specs=[
                pl.BlockSpec((bm, D), lambda i: (i, 0)),  # x tile (streamed)
                const((1, D)),    # gamma
                const((1, D)),    # beta
                const((D, H)),    # w1 (bf16)
                const((1, H)),    # b1
                const((H, D)),    # w2 (bf16)
                const((1, D)),    # b2
            ],
            out_specs=pl.BlockSpec((bm, D), lambda i: (i, 0)),
        ),
        compiler_params=pltpu.CompilerParams(
            dimension_semantics=("parallel",),   # rows shard across TCs (v7x)
            vmem_limit_bytes=int(min(max(vmem_estimate(bm),
                                         32 * 1024 * 1024), vmem_cap)),
        ),
    )(x2, g2, be2, w1b, b1_2, w2b, b2_2)

    if rows_p != rows:
        out = out[:rows]
    return out.reshape(B, N, D)


def init_params(key, dim, mlp_ratio=4, dtype=jnp.float32):
    """Deterministic parameter init (shapes follow the PyTorch module)."""
    hidden = dim * mlp_ratio
    k1, k2, k3, k4 = jax.random.split(key, 4)
    gamma = jnp.ones((dim,), dtype)                 # LayerNorm defaults
    beta = jnp.zeros((dim,), dtype)
    lim1 = 1.0 / jnp.sqrt(dim)                      # nn.Linear uniform init
    lim2 = 1.0 / jnp.sqrt(hidden)
    w1 = jax.random.uniform(k1, (dim, hidden), dtype, -lim1, lim1)
    b1 = jax.random.uniform(k2, (hidden,), dtype, -lim1, lim1)
    w2 = jax.random.uniform(k3, (hidden, dim), dtype, -lim2, lim2)
    b2 = jax.random.uniform(k4, (dim,), dtype, -lim2, lim2)
    return gamma, beta, w1, b1, w2, b2


def _reference(x, gamma, beta, w1, b1, w2, b2):
    xf = x.astype(jnp.float32)
    mean = jnp.mean(xf, axis=-1, keepdims=True)
    var = jnp.mean((xf - mean) ** 2, axis=-1, keepdims=True)
    xn = (xf - mean) / jnp.sqrt(var + 1e-5) * gamma + beta
    h = xn @ w1 + b1
    h = 0.5 * h * (1.0 + lax.erf(h / jnp.sqrt(2.0)))
    return (h @ w2 + b2).astype(x.dtype)


if __name__ == "__main__":
    dim = 128          # lane-dense last dim
    mlp_ratio = 4

    key = jax.random.PRNGKey(0)
    kx, kp, kx2 = jax.random.split(key, 3)
    gamma, beta, w1, b1, w2, b2 = init_params(kp, dim, mlp_ratio)

    # Shape 1: (B=2, N=8, dim=128) — rows divide the tile evenly.
    x = jax.random.normal(kx, (2, 8, dim), jnp.float32)
    out = jax.block_until_ready(mlp_subblock(x, gamma, beta, w1, b1, w2, b2))
    ref = _reference(x, gamma, beta, w1, b1, w2, b2)
    assert out.shape == x.shape
    assert jnp.allclose(out, ref, atol=5e-2, rtol=5e-2), "mismatch (shape 1)"

    # Shape 2: odd token count — exercises the padded-tail path.
    x_odd = jax.random.normal(kx2, (1, 5, dim), jnp.float32)
    out_odd = jax.block_until_ready(
        mlp_subblock(x_odd, gamma, beta, w1, b1, w2, b2))
    ref_odd = _reference(x_odd, gamma, beta, w1, b1, w2, b2)
    assert out_odd.shape == x_odd.shape
    assert jnp.allclose(out_odd, ref_odd, atol=5e-2, rtol=5e-2), "mismatch (shape 2)"

    print("KERNEL_OK")
</pallas_src>

<mosaic_0001>
module attributes {stable_mosaic.version = 11 : i64} {
  func.func @_mlp_subblock_kernel(%arg0: i32, %arg1: memref<16x128xf32, #tpu.memory_space<vmem>>, %arg2: memref<1x128xf32, #tpu.memory_space<vmem>>, %arg3: memref<1x128xf32, #tpu.memory_space<vmem>>, %arg4: memref<128x512xbf16, #tpu.memory_space<vmem>>, %arg5: memref<1x512xf32, #tpu.memory_space<vmem>>, %arg6: memref<512x128xbf16, #tpu.memory_space<vmem>>, %arg7: memref<1x128xf32, #tpu.memory_space<vmem>>, %arg8: memref<16x128xf32, #tpu.memory_space<vmem>>) attributes {dimension_semantics = [#tpu.dimension_semantics<parallel>], iteration_bounds = array<i64: 1>, scalar_prefetch = 0 : i64, scratch_operands = 0 : i64, tpu.core_type = #tpu.core_type<tc>, window_params = [{transform_indices = @transform_0, window_bounds = array<i64: 16, 128>}, {pipeline_mode = #tpu.pipeline_mode<synchronous>, transform_indices = @transform_1, window_bounds = array<i64: 1, 128>}, {pipeline_mode = #tpu.pipeline_mode<synchronous>, transform_indices = @transform_2, window_bounds = array<i64: 1, 128>}, {pipeline_mode = #tpu.pipeline_mode<synchronous>, transform_indices = @transform_3, window_bounds = array<i64: 128, 512>}, {pipeline_mode = #tpu.pipeline_mode<synchronous>, transform_indices = @transform_4, window_bounds = array<i64: 1, 512>}, {pipeline_mode = #tpu.pipeline_mode<synchronous>, transform_indices = @transform_5, window_bounds = array<i64: 512, 128>}, {pipeline_mode = #tpu.pipeline_mode<synchronous>, transform_indices = @transform_6, window_bounds = array<i64: 1, 128>}, {transform_indices = @transform_7, window_bounds = array<i64: 16, 128>}]} {
    %c0 = arith.constant 0 : index
    %c0_0 = arith.constant 0 : index
    %0 = vector.load %arg1[%c0, %c0_0] : memref<16x128xf32, #tpu.memory_space<vmem>>, vector<16x128xf32>
    %cst = arith.constant dense<0.000000e+00> : vector<16xf32>
    %1 = vector.multi_reduction <add>, %0, %cst [1] : vector<16x128xf32> to vector<16xf32>
    %2 = vector.shape_cast %1 : vector<16xf32> to vector<16x1xf32>
    %cst_1 = arith.constant 1.280000e+02 : f32
    %3 = vector.broadcast %cst_1 : f32 to vector<16x1xf32>
    %4 = arith.divf %2, %3 : vector<16x1xf32>
    %5 = vector.broadcast %4 : vector<16x1xf32> to vector<16x128xf32>
    %6 = arith.subf %0, %5 : vector<16x128xf32>
    %7 = arith.mulf %6, %6 : vector<16x128xf32>
    %cst_2 = arith.constant dense<0.000000e+00> : vector<16xf32>
    %8 = vector.multi_reduction <add>, %7, %cst_2 [1] : vector<16x128xf32> to vector<16xf32>
    %9 = vector.shape_cast %8 : vector<16xf32> to vector<16x1xf32>
    %cst_3 = arith.constant 1.280000e+02 : f32
    %10 = vector.broadcast %cst_3 : f32 to vector<16x1xf32>
    %11 = arith.divf %9, %10 : vector<16x1xf32>
    %cst_4 = arith.constant 9.99999974E-6 : f32
    %12 = vector.broadcast %cst_4 : f32 to vector<16x1xf32>
    %13 = arith.addf %11, %12 : vector<16x1xf32>
    %14 = math.rsqrt %13 : vector<16x1xf32>
    %15 = vector.broadcast %14 : vector<16x1xf32> to vector<16x128xf32>
    %16 = arith.mulf %6, %15 : vector<16x128xf32>
    %c0_5 = arith.constant 0 : index
    %c0_6 = arith.constant 0 : index
    %17 = vector.load %arg2[%c0_5, %c0_6] : memref<1x128xf32, #tpu.memory_space<vmem>>, vector<1x128xf32>
    %18 = vector.broadcast %17 : vector<1x128xf32> to vector<16x128xf32>
    %19 = arith.mulf %16, %18 : vector<16x128xf32>
    %c0_7 = arith.constant 0 : index
    %c0_8 = arith.constant 0 : index
    %20 = vector.load %arg3[%c0_7, %c0_8] : memref<1x128xf32, #tpu.memory_space<vmem>>, vector<1x128xf32>
    %21 = vector.broadcast %20 : vector<1x128xf32> to vector<16x128xf32>
    %22 = arith.addf %19, %21 : vector<16x128xf32>
    %23 = arith.truncf %22 : vector<16x128xf32> to vector<16x128xbf16>
    %c0_9 = arith.constant 0 : index
    %c0_10 = arith.constant 0 : index
    %24 = vector.load %arg4[%c0_9, %c0_10] : memref<128x512xbf16, #tpu.memory_space<vmem>>, vector<128x512xbf16>
    %cst_11 = arith.constant dense<0.000000e+00> : vector<16x512xf32>
    %25 = tpu.matmul %23, %24, %cst_11 {dimension_numbers = #tpu.dot_dimension_numbers<[1], [0], [0], [1], [0, 0, 1, 1], [], []>} : vector<16x128xbf16>, vector<128x512xbf16>, vector<16x512xf32> -> vector<16x512xf32>
    %c0_12 = arith.constant 0 : index
    %c0_13 = arith.constant 0 : index
    %26 = vector.load %arg5[%c0_12, %c0_13] : memref<1x512xf32, #tpu.memory_space<vmem>>, vector<1x512xf32>
    %27 = vector.broadcast %26 : vector<1x512xf32> to vector<16x512xf32>
    %28 = arith.addf %25, %27 : vector<16x512xf32>
    %cst_14 = arith.constant 5.000000e-01 : f32
    %29 = vector.broadcast %cst_14 : f32 to vector<16x512xf32>
    %30 = arith.mulf %29, %28 : vector<16x512xf32>
    %cst_15 = arith.constant 0.707106769 : f32
    %31 = vector.broadcast %cst_15 : f32 to vector<16x512xf32>
    %32 = arith.mulf %28, %31 : vector<16x512xf32>
    %33 = math.erf %32 : vector<16x512xf32>
    %cst_16 = arith.constant 1.000000e+00 : f32
    %34 = vector.broadcast %cst_16 : f32 to vector<16x512xf32>
    %35 = arith.addf %34, %33 : vector<16x512xf32>
    %36 = arith.mulf %30, %35 : vector<16x512xf32>
    %37 = arith.truncf %36 : vector<16x512xf32> to vector<16x512xbf16>
    %c0_17 = arith.constant 0 : index
    %c0_18 = arith.constant 0 : index
    %38 = vector.load %arg6[%c0_17, %c0_18] : memref<512x128xbf16, #tpu.memory_space<vmem>>, vector<512x128xbf16>
    %cst_19 = arith.constant dense<0.000000e+00> : vector<16x128xf32>
    %39 = tpu.matmul %37, %38, %cst_19 {dimension_numbers = #tpu.dot_dimension_numbers<[1], [0], [0], [1], [0, 0, 1, 1], [], []>} : vector<16x512xbf16>, vector<512x128xbf16>, vector<16x128xf32> -> vector<16x128xf32>
    %c0_20 = arith.constant 0 : index
    %c0_21 = arith.constant 0 : index
    %40 = vector.load %arg7[%c0_20, %c0_21] : memref<1x128xf32, #tpu.memory_space<vmem>>, vector<1x128xf32>
    %41 = vector.broadcast %40 : vector<1x128xf32> to vector<16x128xf32>
    %42 = arith.addf %39, %41 : vector<16x128xf32>
    %c0_22 = arith.constant 0 : index
    %c0_23 = arith.constant 0 : index
    %43 = vector.load %arg8[%c0_22, %c0_23] : memref<16x128xf32, #tpu.memory_space<vmem>>, vector<16x128xf32>
    tpu.vector_store %arg8[%c0_22, %c0_23], %42 {strides = array<i32>} : memref<16x128xf32, #tpu.memory_space<vmem>>, vector<16x128xf32>,
    return
  }
  func.func @transform_0(%arg0: i32) -> (i32, i32) {
    %c0_i32 = arith.constant 0 : i32
    %c0_i32_0 = arith.constant 0 : i32
    return %arg0, %c0_i32 : i32, i32
  }
  func.func @transform_1(%arg0: i32) -> (i32, i32) {
    %c0_i32 = arith.constant 0 : i32
    %c0_i32_0 = arith.constant 0 : i32
    %c0_i32_1 = arith.constant 0 : i32
    return %c0_i32, %c0_i32_0 : i32, i32
  }
  func.func @transform_2(%arg0: i32) -> (i32, i32) {
    %c0_i32 = arith.constant 0 : i32
    %c0_i32_0 = arith.constant 0 : i32
    %c0_i32_1 = arith.constant 0 : i32
    return %c0_i32, %c0_i32_0 : i32, i32
  }
  func.func @transform_3(%arg0: i32) -> (i32, i32) {
    %c0_i32 = arith.constant 0 : i32
    %c0_i32_0 = arith.constant 0 : i32
    %c0_i32_1 = arith.constant 0 : i32
    return %c0_i32, %c0_i32_0 : i32, i32
  }
  func.func @transform_4(%arg0: i32) -> (i32, i32) {
    %c0_i32 = arith.constant 0 : i32
    %c0_i32_0 = arith.constant 0 : i32
    %c0_i32_1 = arith.constant 0 : i32
    return %c0_i32, %c0_i32_0 : i32, i32
  }
  func.func @transform_5(%arg0: i32) -> (i32, i32) {
    %c0_i32 = arith.constant 0 : i32
    %c0_i32_0 = arith.constant 0 : i32
    %c0_i32_1 = arith.constant 0 : i32
    return %c0_i32, %c0_i32_0 : i32, i32
  }
  func.func @transform_6(%arg0: i32) -> (i32, i32) {
    %c0_i32 = arith.constant 0 : i32
    %c0_i32_0 = arith.constant 0 : i32
    %c0_i32_1 = arith.constant 0 : i32
    return %c0_i32, %c0_i32_0 : i32, i32
  }
  func.func @transform_7(%arg0: i32) -> (i32, i32) {
    %c0_i32 = arith.constant 0 : i32
    %c0_i32_0 = arith.constant 0 : i32
    return %arg0, %c0_i32 : i32, i32
  }
}

</mosaic_0001>

<bundles_post_ra>
// kernel: mlp_subblock.1
= control target key start
LH: loop header
LB: loop body
LE: loop exit
PB: predicated region body
PF: predicated region fallthrough
CT: control target
= control target key end

     0   :  { %s1283_s0 = inlined_call_operand.vmem [shape: f32[16,128], index: 0, kind: input, shape index: {}]   ;;  %s1284_s1 = inlined_call_operand.vmem [shape: f32[1,128], index: 1, kind: input, shape index: {}]   ;;  %s1285_s2 = inlined_call_operand.vmem [shape: f32[1,128], index: 2, kind: input, shape index: {}]   ;;  %s1286_s3 = inlined_call_operand.vmem [shape: bf16[128,512], index: 3, kind: input, shape index: {}]   ;;  %s1287_s4 = inlined_call_operand.vmem [shape: f32[1,512], index: 4, kind: input, shape index: {}]   ;;  %s1288_s5 = inlined_call_operand.vmem [shape: bf16[512,128], index: 5, kind: input, shape index: {}]   ;;  %s1289_s6 = inlined_call_operand.vmem [shape: f32[1,128], index: 6, kind: input, shape index: {}]   ;;  %s1290_s7 = inlined_call_operand.hbm [shape: f32[16,128], index: 7, kind: output, shape index: {}]  }
   0x1   :  { %v28_v0 = vld [vmem:[%s1283_s0] sm:$0xff]  ;;  %v29_v1 = vld [vmem:[%s1283_s0 + $0x8] sm:$0xff] }
   0x2   :  { %30 = vadd.xlane.f32.xlu0 %v28_v0  ;;  %v894_v2 = vld [vmem:[%s1286_s3 + $0xe4] ss:$16 sps:$4 sm:$0xff]   ;;  %v896_v3 = vld [vmem:[%s1286_s3 + $0xec] ss:$16 sps:$4 sm:$0xff]   ;;  %v898_v4 = vld [vmem:[%s1286_s3 + $0xe0] ss:$16 sps:$4 sm:$0xff]  }
   0x3   :  { %v899_v5 = vld [vmem:[%s1286_s3 + $0xe8] ss:$16 sps:$4 sm:$0xff]   ;;  %286 = vmatprep.subr.bf16.mxu0 %v894_v2  ;;  %329 = vmatprep.subr.bf16.mxu1 %v896_v3 }
   0x4   :  { %287 = vmatpush1.bf16.msra.mxu0 %v898_v4  ;;  %330 = vmatpush1.bf16.msra.mxu1 %v899_v5 }
   0x6   :  { %32 = vadd.xlane.f32.xlu0 %v29_v1 }
   0x7   :  { %12 = vsyncpa [#allocation3], 0  ;;  %v900_v14 = vld [vmem:[%s1286_s3 + $0xc4] ss:$16 sps:$4 sm:$0xff]   ;;  %v902_v15 = vld [vmem:[%s1286_s3 + $0xcc] ss:$16 sps:$4 sm:$0xff]  }
   0x8   :  { %v904_v16 = vld [vmem:[%s1286_s3 + $0xc0] ss:$16 sps:$4 sm:$0xff]   ;;  %v905_v17 = vld [vmem:[%s1286_s3 + $0xc8] ss:$16 sps:$4 sm:$0xff]   ;;  %288 = vmatprep.subr.bf16.mxu0 %v900_v14  ;;  %331 = vmatprep.subr.bf16.mxu1 %v902_v15  ;;  %v906_v18 = vld [vmem:[%s1286_s3 + $0xa4] ss:$16 sps:$4 sm:$0xff]  }
   0x9   :  { %289 = vmatpush1.bf16.msra.mxu0 %v904_v16  ;;  %332 = vmatpush1.bf16.msra.mxu1 %v905_v17  ;;  %v908_v19 = vld [vmem:[%s1286_s3 + $0xac] ss:$16 sps:$4 sm:$0xff]   ;;  %v910_v20 = vld [vmem:[%s1286_s3 + $0xa0] ss:$16 sps:$4 sm:$0xff]   ;;  %v911_v21 = vld [vmem:[%s1286_s3 + $0xa8] ss:$16 sps:$4 sm:$0xff]  }
   0xa   :  { %290 = vmatprep.subr.bf16.mxu0 %v906_v18  ;;  %333 = vmatprep.subr.bf16.mxu1 %v908_v19  ;;  %v912_v22 = vld [vmem:[%s1286_s3 + $0x84] ss:$16 sps:$4 sm:$0xff]   ;;  %v914_v23 = vld [vmem:[%s1286_s3 + $0x8c] ss:$16 sps:$4 sm:$0xff]   ;;  %v916_v24 = vld [vmem:[%s1286_s3 + $0x80] ss:$16 sps:$4 sm:$0xff]  }
   0xb   :  { %v917_v25 = vld [vmem:[%s1286_s3 + $0x88] ss:$16 sps:$4 sm:$0xff]   ;;  %v918_v26 = vld [vmem:[%s1286_s3 + $0x64] ss:$16 sps:$4 sm:$0xff]   ;;  %v920_v27 = vld [vmem:[%s1286_s3 + $0x6c] ss:$16 sps:$4 sm:$0xff]  }
   0xc   :  { %v922_v28 = vld [vmem:[%s1286_s3 + $0x60] ss:$16 sps:$4 sm:$0xff]   ;;  %v923_v29 = vld [vmem:[%s1286_s3 + $0x68] ss:$16 sps:$4 sm:$0xff]   ;;  %v924_v30 = vld [vmem:[%s1286_s3 + $0x44] ss:$16 sps:$4 sm:$0xff]  }
   0xd   :  { %291 = vmatpush1.bf16.msra.mxu0 %v910_v20  ;;  %334 = vmatpush1.bf16.msra.mxu1 %v911_v21  ;;  %v926_v31 = vld [vmem:[%s1286_s3 + $0x4c] ss:$16 sps:$4 sm:$0xff]   ;;  %v928_v32 = vld [vmem:[%s1286_s3 + $0x40] ss:$16 sps:$4 sm:$0xff]   ;;  %v929_v33 = vld [vmem:[%s1286_s3 + $0x48] ss:$16 sps:$4 sm:$0xff]  }
   0xe   :  { %292 = vmatprep.subr.bf16.mxu0 %v912_v22  ;;  %335 = vmatprep.subr.bf16.mxu1 %v914_v23  ;;  %v930_v34 = vld [vmem:[%s1286_s3 + $0x24] ss:$16 sps:$4 sm:$0xff]   ;;  %v932_v35 = vld [vmem:[%s1286_s3 + $0x2c] ss:$16 sps:$4 sm:$0xff]   ;;  %v1016_v36 = vmov 0   ;;  %s1017_s10 = smov [#allocation2]  }
   0xf   :  { %318 = vmatprep.mubr.bf16.mxu0 %v1016_v36  ;;  %361 = vmatprep.mubr.bf16.mxu1 %v1016_v36  ;;  %v934_v37 = vld [vmem:[%s1286_s3 + $0x20] ss:$16 sps:$4 sm:$0xff]   ;;  %v935_v38 = vld [vmem:[%s1286_s3 + $0x28] ss:$16 sps:$4 sm:$0xff]   ;;  %v936_v39 = vld [vmem:[%s1286_s3 + $0x4] ss:$16 sps:$4 sm:$0xff]  }
  0x10   :  { %v938_v40 = vld [vmem:[%s1286_s3 + $0xc] ss:$16 sps:$4 sm:$0xff]   ;;  %v940_v41 = vld [vmem:[%s1286_s3] ss:$16 sps:$4 sm:$0xff]   ;;  %v941_v42 = vld [vmem:[%s1286_s3 + $0x8] ss:$16 sps:$4 sm:$0xff]  }
  0x11   :  { %293 = vmatpush1.bf16.msra.mxu0 %v916_v24  ;;  %336 = vmatpush1.bf16.msra.mxu1 %v917_v25  ;;  %v779_v51 = vld [vmem:[%s1284_s1] ss:$0 sm:$0xff]  ;;  %v942_v60 = vld [vmem:[%s1288_s5 + $0x78] sm:$0xff]   ;;  %v948_v2 = vld [vmem:[%s1288_s5 + $0x30] sm:$0xff]   ;;  %s768_s11 = sshll.u32 %s1017_s10, 4  ;;  %s769_s11 = int_to_ptr.vmem [resolvable:$true] %s768_s11 }
  0x12   :  { %294 = vmatprep.subr.bf16.mxu0 %v918_v26  ;;  %337 = vmatprep.subr.bf16.mxu1 %v920_v27  ;;  %v780_v55 = vld [vmem:[%s1285_s2] ss:$0 sm:$0xff]  ;;  %v943_v61 = vld [vmem:[%s1288_s5 + $0xf8] sm:$0xff]   ;;  %v949_v3 = vld [vmem:[%s1288_s5 + $0xb0] sm:$0xff]   ;;  %p999_p1 = scmp.lt.s32.totalorder %s769_s11, %s769_s11 }
  0x13   :  { %v944_v62 = vld [vmem:[%s1288_s5 + $0x38] sm:$0xff]   ;;  %v950_v4 = vld [vmem:[%s1288_s5 + $0x68] sm:$0xff]   ;;  %v962_v16 = vld [vmem:[%s1288_s5 + $0x50] sm:$0xff]  }
  0x14   :  { %v945_v63 = vld [vmem:[%s1288_s5 + $0xb8] sm:$0xff]   ;;  %v951_v5 = vld [vmem:[%s1288_s5 + $0xe8] sm:$0xff]   ;;  %v963_v17 = vld [vmem:[%s1288_s5 + $0xd0] sm:$0xff]  }
  0x15   :  { %295 = vmatpush1.bf16.msra.mxu0 %v922_v28  ;;  %338 = vmatpush1.bf16.msra.mxu1 %v923_v29  ;;  %v960_v14 = vld [vmem:[%s1288_s5 + $0x18] sm:$0xff]   ;;  %v964_v18 = vld [vmem:[%s1288_s5 + $0x10] sm:$0xff]   ;;  %v966_v20 = vld [vmem:[%s1288_s5 + $0x48] sm:$0xff]   ;;  %v106_v28 = vlaneseq }
  0x16   :  { %296 = vmatprep.subr.bf16.mxu0 %v924_v30  ;;  %339 = vmatprep.subr.bf16.mxu1 %v926_v31  ;;  %v961_v15 = vld [vmem:[%s1288_s5 + $0x98] sm:$0xff]   ;;  %v965_v19 = vld [vmem:[%s1288_s5 + $0x90] sm:$0xff]   ;;  %v967_v21 = vld [vmem:[%s1288_s5 + $0xc8] sm:$0xff]  }
  0x17   :  { %v968_v22 = vld [vmem:[%s1288_s5 + $0x8] sm:$0xff]   ;;  %v970_v24 = vld [vmem:[%s1288_s5 + $0x40] sm:$0xff]   ;;  %v107_v29 = vshrl.u32 %v106_v28, 7 }
  0x18   :  { %v969_v23 = vld [vmem:[%s1288_s5 + $0x88] sm:$0xff]   ;;  %v971_v25 = vld [vmem:[%s1288_s5 + $0xc0] sm:$0xff]  }
  0x19   :  { %297 = vmatpush1.bf16.msra.mxu0 %v928_v32  ;;  %340 = vmatpush1.bf16.msra.mxu1 %v929_v33  ;;  %v972_v26 = vld [vmem:[%s1288_s5] sm:$0xff]   ;;  %v108_v30 = vsub.s32 0, %v107_v29  ;;  %v116_v31 = vsub.s32 2, %v107_v29  ;;  %v112_v33 = vsub.s32 1, %v107_v29 }
  0x1a   :  { %298 = vmatprep.subr.bf16.mxu0 %v930_v34  ;;  %341 = vmatprep.subr.bf16.mxu1 %v932_v35  ;;  %v973_v27 = vld [vmem:[%s1288_s5 + $0x80] sm:$0xff]   ;;  %v120_v34 = vsub.s32 3, %v107_v29 }
  0x1b   :  { %v104_v32 = vld [vmem:[%s1287_s4] sm:$0xf] }
  0x1c   :  { %v109_v35 = vrot.slane %v104_v32, %v108_v30  ;;  %v117_v36 = vrot.slane %v104_v32, %v116_v31 }
  0x1d   :  { %299 = vmatpush1.bf16.msra.mxu0 %v934_v37  ;;  %342 = vmatpush1.bf16.msra.mxu1 %v935_v38 }
  0x1e   :  { %300 = vmatprep.subr.bf16.mxu0 %v936_v39  ;;  %343 = vmatprep.subr.bf16.mxu1 %v938_v40  ;;  %v113_v39 = vrot.slane %v104_v32, %v112_v33  ;;  %v121_v40 = vrot.slane %v104_v32, %v120_v34 }
  0x21   :  { %301 = vmatpush1.bf16.msra.mxu0 %v940_v41  ;;  %344 = vmatpush1.bf16.msra.mxu1 %v941_v42 }
  0x22   :  { %846 = vmatprep.subr.bf16.mxu0 %v942_v60  ;;  %868 = vmatprep.subr.bf16.mxu1 %v943_v61 }
  0x8b   :  { %v31_v6 = vpop.xlane.xlu0 %30 }
  0x8c   :  { %v35_v7 = vmul.f32 0.0078125, %v31_v6  ;;  %v952_v6 = vld [vmem:[%s1288_s5 + $0x28] sm:$0xff]  }
  0x8e   :  { %v1078_v8 = vsub.f32 %v28_v0, %v35_v7  ;;  %v946_v0 = vld [vmem:[%s1288_s5 + $0x70] sm:$0xff]   ;;  %v953_v7 = vld [vmem:[%s1288_s5 + $0xa8] sm:$0xff]  }
  0x8f   :  { %v33_v9 = vpop.xlane.xlu0 %32 }
  0x90   :  { %v36_v10 = vmul.f32 0.0078125, %v33_v9  ;;  %v39_v11 = vmul.f32 %v1078_v8, %v1078_v8  ;;  %v955_v9 = vld [vmem:[%s1288_s5 + $0xe0] sm:$0xff]  }
  0x92   :  { %v1082_v12 = vsub.f32 %v29_v1, %v36_v10  ;;  %41 = vadd.xlane.f32.xlu1 %v39_v11  ;;  %v947_v1 = vld [vmem:[%s1288_s5 + $0xf0] sm:$0xff]   ;;  %v956_v10 = vld [vmem:[%s1288_s5 + $0x20] sm:$0xff]  }
  0x93   :  { %v957_v11 = vld [vmem:[%s1288_s5 + $0xa0] sm:$0xff]  }
  0x94   :  { %v40_v13 = vmul.f32 %v1082_v12, %v1082_v12 }
  0x96   :  { %43 = vadd.xlane.f32.xlu1 %v40_v13  ;;  %v959_v13 = vld [vmem:[%s1288_s5 + $0xd8] sm:$0xff]  }
 0x11b   :  { %v42_v43 = vpop.xlane.xlu1 %41 }
 0x11c   :  { %v45_v44 = vmul.f32 0.0078125, %v42_v43 }
 0x11e   :  { %v47_v45 = vadd.f32 1e-05, %v45_v44 }
 0x11f   :  { %v44_v46 = vpop.xlane.xlu1 %43 }
 0x120   :  { %974 = vrsqrt.f32 %v47_v45  ;;  %v46_v47 = vmul.f32 0.0078125, %v44_v46 }
 0x122   :  { %v48_v48 = vadd.f32 1e-05, %v46_v47 }
 0x124   :  { %976 = vrsqrt.f32 %v48_v48 }
 0x12d   :  { %v975_v49 = vpop.eup %974 }
 0x12e   :  { %v51_v50 = vmul.f32 %v975_v49, %v1078_v8  ;;  %v954_v8 = vld [vmem:[%s1288_s5 + $0x60] sm:$0xff]  }
 0x130   :  { %v60_v54 = vmul.f32 %v779_v51, %v51_v50 }
 0x131   :  { %v977_v52 = vpop.eup %976 }
 0x132   :  { %v52_v53 = vmul.f32 %v977_v52, %v1082_v12  ;;  %v69_v57 = vadd.f32 %v780_v55, %v60_v54  ;;  %v958_v12 = vld [vmem:[%s1288_s5 + $0x58] sm:$0xff]  }
 0x134   :  { %v61_v56 = vmul.f32 %v779_v51, %v52_v53 }
 0x136   :  { %v70_v58 = vadd.f32 %v780_v55, %v61_v56 }
 0x138   :  { %v71_v59 = vpack.c.bf16 %v70_v58, %v69_v57 }
 0x13a   :  { %319 = vmatmul.mubr.bf16.vlgmr.msra.gmra.mxu0 %v71_v59  ;;  %362 = vmatmul.mubr.bf16.vlgmr.msra.gmra.mxu1 %v71_v59 }
 0x13b   :  { %847 = vmatpush3.bf16.msra.mxu0 %v944_v62  ;;  %869 = vmatpush3.bf16.msra.mxu1 %v945_v63 }
 0x13c   :  { %848 = vmatprep.subr.bf16.mxu0 %v946_v0  ;;  %870 = vmatprep.subr.bf16.mxu1 %v947_v1 }
 0x13f   :  { %849 = vmatpush3.bf16.msra.mxu0 %v948_v2  ;;  %871 = vmatpush3.bf16.msra.mxu1 %v949_v3 }
 0x140   :  { %850 = vmatprep.subr.bf16.mxu0 %v950_v4  ;;  %872 = vmatprep.subr.bf16.mxu1 %v951_v5 }
 0x143   :  { %851 = vmatpush3.bf16.msra.mxu0 %v952_v6  ;;  %873 = vmatpush3.bf16.msra.mxu1 %v953_v7 }
 0x144   :  { %852 = vmatprep.subr.bf16.mxu0 %v954_v8  ;;  %874 = vmatprep.subr.bf16.mxu1 %v955_v9 }
 0x147   :  { %853 = vmatpush3.bf16.msra.mxu0 %v956_v10  ;;  %875 = vmatpush3.bf16.msra.mxu1 %v957_v11 }
 0x148   :  { %854 = vmatprep.subr.bf16.mxu0 %v958_v12  ;;  %876 = vmatprep.subr.bf16.mxu1 %v959_v13 }
 0x14b   :  { %855 = vmatpush3.bf16.msra.mxu0 %v960_v14  ;;  %877 = vmatpush3.bf16.msra.mxu1 %v961_v15 }
 0x14c   :  { %856 = vmatprep.subr.bf16.mxu0 %v962_v16  ;;  %878 = vmatprep.subr.bf16.mxu1 %v963_v17 }
 0x14f   :  { %857 = vmatpush3.bf16.msra.mxu0 %v964_v18  ;;  %879 = vmatpush3.bf16.msra.mxu1 %v965_v19 }
 0x150   :  { %858 = vmatprep.subr.bf16.mxu0 %v966_v20  ;;  %880 = vmatprep.subr.bf16.mxu1 %v967_v21 }
 0x153   :  { %859 = vmatpush3.bf16.msra.mxu0 %v968_v22  ;;  %881 = vmatpush3.bf16.msra.mxu1 %v969_v23 }
 0x154   :  { %860 = vmatprep.subr.bf16.mxu0 %v970_v24  ;;  %882 = vmatprep.subr.bf16.mxu1 %v971_v25 }
 0x157   :  { %861 = vmatpush3.bf16.msra.mxu0 %v972_v26  ;;  %883 = vmatpush3.bf16.msra.mxu1 %v973_v27 }
 0x1fa   :  { %v320_v37 = vpop.f32.mrf.mxu0  ;;  %v363_v38 = vpop.f32.mrf.mxu1 }
 0x1fb   :  { %v321_v41 = vadd.f32 %v320_v37, %v109_v35  ;;  %v364_v42 = vadd.f32 %v363_v38, %v117_v36  ;;  %v813_v37 = vld [vmem:[%s1289_s6] ss:$0 sm:$0xff]  ;;  %s994_s6 = scalar_lea.vmem %s769_s11, 256 }
 0x1fc   :  { %v322_v43 = vpop.f32.mrf.mxu0  ;;  %v365_v44 = vpop.f32.mrf.mxu1  ;;  %p995_p0 = scmp.ne.s32.totalorder %s769_s11, %s994_s6  ;;  %p1000_p2 = scmp.lt.s32.totalorder %s994_s6, %s994_s6 }
 0x1fd   :  { %v380_v45 = vmul.f32 0.70710677, %v321_v41  ;;  %v382_v46 = vmul.f32 0.70710677, %v364_v42  ;;  %v323_v47 = vadd.f32 %v322_v43, %v113_v39  ;;  %v366_v48 = vadd.f32 %v365_v44, %v121_v40 }
 0x1fe   :  { %v324_v49 = vpop.f32.mrf.mxu0  ;;  %v367_v50 = vpop.f32.mrf.mxu1  ;;  %v372_v5 = vmul.f32 0.5, %v321_v41  ;;  %v374_v23 = vmul.f32 0.5, %v364_v42  ;;  %p1001_p3 = por %p1000_p2, %p999_p1 }
 0x1ff   :  { %v325_v51 = vadd.f32 %v324_v49, %v109_v35  ;;  %v368_v52 = vadd.f32 %v367_v50, %v117_v36  ;;  %978 = verf.f32 %v380_v45  ;;  %v381_v53 = vmul.f32 0.70710677, %v323_v47 }
 0x200   :  { %v326_v54 = vpop.f32.mrf.mxu0  ;;  %v369_v55 = vpop.f32.mrf.mxu1  ;;  %980 = verf.f32 %v382_v46  ;;  %v383_v56 = vmul.f32 0.70710677, %v366_v48  ;;  %v373_v6 = vmul.f32 0.5, %v323_v47  ;;  %v375_v19 = vmul.f32 0.5, %v366_v48  ;;  %p1002_p4 = pnand %p1001_p3, %p995_p0 }
 0x201   :  { %v384_v57 = vmul.f32 0.70710677, %v325_v51  ;;  %982 = verf.f32 %v381_v53  ;;  %v386_v58 = vmul.f32 0.70710677, %v368_v52  ;;  %v327_v59 = vadd.f32 %v326_v54, %v113_v39 }
 0x202   :  { %v370_v60 = vadd.f32 %v369_v55, %v121_v40  ;;  %984 = verf.f32 %v383_v56  ;;  %v376_v12 = vmul.f32 0.5, %v325_v51  ;;  %v378_v16 = vmul.f32 0.5, %v368_v52 }
 0x203   :  { %986 = verf.f32 %v384_v57  ;;  %v385_v61 = vmul.f32 0.70710677, %v327_v59  ;;  %v377_v17 = vmul.f32 0.5, %v327_v59 }
 0x204   :  { %988 = verf.f32 %v386_v58  ;;  %v387_v62 = vmul.f32 0.70710677, %v370_v60  ;;  %v379_v21 = vmul.f32 0.5, %v370_v60 }
 0x205   :  { %990 = verf.f32 %v385_v61 }
 0x206   :  { %992 = verf.f32 %v387_v62 }
 0x20c   :  { %v979_v63 = vpop.eup %978 }
 0x20d   :  { %v981_v0 = vpop.eup %980  ;;  %v396_v10 = vadd.f32 1.0, %v979_v63 }
 0x20e   :  { %v983_v1 = vpop.eup %982  ;;  %v398_v15 = vadd.f32 1.0, %v981_v0 }
 0x20f   :  { %v985_v2 = vpop.eup %984  ;;  %v397_v7 = vadd.f32 1.0, %v983_v1  ;;  %v404_v27 = vmul.f32 %v396_v10, %v372_v5 }
 0x210   :  { %v987_v3 = vpop.eup %986  ;;  %v399_v11 = vadd.f32 1.0, %v985_v2  ;;  %v406_v30 = vmul.f32 %v398_v15, %v374_v23 }
 0x211   :  { %v989_v4 = vpop.eup %988  ;;  %v400_v8 = vadd.f32 1.0, %v987_v3  ;;  %v405_v24 = vmul.f32 %v397_v7, %v373_v6 }
 0x212   :  { %v991_v9 = vpop.eup %990  ;;  %v402_v13 = vadd.f32 1.0, %v989_v4  ;;  %v407_v28 = vmul.f32 %v399_v11, %v375_v19 }
 0x213   :  { %v993_v14 = vpop.eup %992  ;;  %v401_v18 = vadd.f32 1.0, %v991_v9  ;;  %v408_v20 = vmul.f32 %v400_v8, %v376_v12 }
 0x214   :  { %v403_v22 = vadd.f32 1.0, %v993_v14  ;;  %v410_v25 = vmul.f32 %v402_v13, %v378_v16 }
 0x215   :  { %v409_v26 = vmul.f32 %v401_v18, %v377_v17  ;;  %v412_v32 = vpack.c.bf16 %v408_v20, %v404_v27 }
 0x216   :  { %v411_v29 = vmul.f32 %v403_v22, %v379_v21  ;;  %v414_v34 = vpack.c.bf16 %v410_v25, %v406_v30 }
 0x217   :  { %v413_v31 = vpack.c.bf16 %v409_v26, %v405_v24 }
 0x218   :  { %v415_v33 = vpack.c.bf16 %v411_v29, %v407_v28 }
 0x219   :  { %711 = vmatprep.mubr.bf16.mxu0 %v413_v31 }
 0x21a   :  { %752 = vmatprep.mubr.bf16.mxu1 %v415_v33  ;;  %712 = vmatmul.mubr.bf16.vlgmr.msra.gmra.mxu0 %v412_v32 }
 0x21b   :  { %753 = vmatmul.mubr.bf16.vlgmr.msra.gmra.mxu1 %v414_v34 }
 0x2da   :  { %v862_v35 = vpop.f32.mrf.mxu0 }
 0x2db   :  { %v884_v36 = vpop.f32.mrf.mxu1 }
 0x2dc   :  { %v863_v38 = vpop.f32.mrf.mxu0 }
 0x2dd   :  { %v864_v39 = vadd.f32 %v863_v38, %v862_v35  ;;  %v885_v40 = vpop.f32.mrf.mxu1 }
 0x2de   :  { %v865_v41 = vpop.f32.mrf.mxu0  ;;  %v886_v43 = vadd.f32 %v885_v40, %v884_v36 }
 0x2df   :  { %v714_v42 = vadd.f32 %v864_v39, %v813_v37  ;;  %v887_v44 = vpop.f32.mrf.mxu1 }
 0x2e0   :  { %v866_v45 = vpop.f32.mrf.mxu0 }
 0x2e1   :  { %v755_v46 = vadd.f32 %v886_v43, %v714_v42  ;;  %v867_v47 = vadd.f32 %v866_v45, %v865_v41  ;;  %v888_v48 = vpop.f32.mrf.mxu1 }
 0x2e2   :  { %v889_v50 = vadd.f32 %v888_v48, %v887_v44 }
 0x2e3   :  { %761 = vst [vmem:[#allocation2] sm:$0xff] %v755_v46  ;;  %v717_v49 = vadd.f32 %v867_v47, %v813_v37 }
 0x2e5   :  { %v758_v51 = vadd.f32 %v889_v50, %v717_v49 }
 0x2e7   :  { %762 = vst [vmem:[#allocation2 + $0x8] sm:$0xff] %v758_v51 }
 0x2e8   :  { %1005 = shalt.err (!%p1002_p4)
}
 0x2e9   :  { %s1018_s12 = smov 128   ;;  %s1019_s0 = smov 8  }
 0x2ea   :  { %774 = dma.vmem_to_hbm [thread:$0]  %s769_s11, 256, %s1290_s7, [#allocation3], %s1018_s12, %s1018_s12, %s1019_s0  }
 0x2eb   :  { %1014 = dma.done.wait [#allocation3], 256  }
 0x2ec   :  { %1015 = vsyncadd [#allocation3], 4294967040 }
 0x2ed   :  { %778 = vsyncpa [#allocation3], 1 }

</bundles_post_ra>
